<compile_context>
chip_gen: v5e
topology: v5e:2x2
jax: 0.10.0
libtpu: 0.0.40
codegen_flags: <defaults>
</compile_context>

<pallas_src>
import functools

import jax
import jax.numpy as jnp
from jax.experimental import pallas as pl
from jax.experimental.pallas import tpu as pltpu


# ----------------------------------------------------------------------------
# Pallas kernels
# ----------------------------------------------------------------------------

def _matmul_bias_kernel(a_ref, b_ref, bias_ref, o_ref, *, relu):
    acc = jnp.dot(a_ref[...], b_ref[...], preferred_element_type=jnp.float32)
    acc = acc + bias_ref[...]          # bias block is (1, tn), broadcasts
    if relu:
        acc = jnp.maximum(acc, 0.0)
    o_ref[...] = acc.astype(o_ref.dtype)


def matmul_bias(a, b, bias, *, relu, tm=512, tn=256):
    """Computes (a @ b + bias), optionally ReLU'd, on the MXU.

    a: (M, K) f32, b: (K, N) f32, bias: (N,) f32.
    K is never padded (full-extent block; the MXU pads internally for free).
    N is only padded when N > tn; M is padded to a multiple of the M tile.
    Inputs are cast to bf16 for the MXU; accumulation and epilogue are f32.
    """
    M, K = a.shape
    K2, N = b.shape
    assert K == K2

    tm_eff = M if M <= tm else tm
    Mp = pl.cdiv(M, tm_eff) * tm_eff
    tn_eff = N if N <= tn else tn
    Np = pl.cdiv(N, tn_eff) * tn_eff

    a_p = a if Mp == M else jnp.pad(a, ((0, Mp - M), (0, 0)))
    b_p = b if Np == N else jnp.pad(b, ((0, 0), (0, Np - N)))
    bias_p = (bias if Np == N else jnp.pad(bias, (0, Np - N))).reshape(1, Np)

    a_p = a_p.astype(jnp.bfloat16)
    b_p = b_p.astype(jnp.bfloat16)

    grid = (Mp // tm_eff, Np // tn_eff)
    out = pl.pallas_call(
        functools.partial(_matmul_bias_kernel, relu=relu),
        out_shape=jax.ShapeDtypeStruct((Mp, Np), jnp.float32),
        grid_spec=pltpu.PrefetchScalarGridSpec(
            num_scalar_prefetch=0,
            grid=grid,
            in_specs=[
                pl.BlockSpec((tm_eff, K), lambda i, j: (i, 0)),
                pl.BlockSpec((K, tn_eff), lambda i, j: (0, j)),
                pl.BlockSpec((1, tn_eff), lambda i, j: (0, j)),
            ],
            out_specs=pl.BlockSpec((tm_eff, tn_eff), lambda i, j: (i, j)),
        ),
        compiler_params=pltpu.CompilerParams(
            dimension_semantics=("parallel", "parallel"),
            vmem_limit_bytes=48 * 1024 * 1024,
        ),
    )(a_p, b_p, bias_p)
    if Mp != M or Np != N:
        out = out[:M, :N]
    return out


def _pool_max_kernel(x_ref, o_ref):
    # x block: (R, tr, lane_w) -> max over the window axis R (pure VPU work).
    o_ref[...] = jnp.max(x_ref[...], axis=0)


def _pool_max_rows(stacked, lane_w=512, tr=64):
    """stacked: (R, L).  Returns (L,) = max over axis 0, computed in Pallas.

    The flat L axis is reshaped to (rows, lane_w) so each grid step produces a
    lane-dense, multi-sublane (tr, lane_w) output tile.
    """
    R, L = stacked.shape
    rows = pl.cdiv(L, lane_w)
    tr_eff = min(tr, pl.cdiv(rows, 8) * 8)       # rows per grid step, mult of 8
    rows_p = pl.cdiv(rows, tr_eff) * tr_eff
    Lp = rows_p * lane_w

    x_p = jnp.pad(stacked, ((0, 0), (0, Lp - L))).reshape(R, rows_p, lane_w)
    out = pl.pallas_call(
        _pool_max_kernel,
        out_shape=jax.ShapeDtypeStruct((rows_p, lane_w), jnp.float32),
        grid_spec=pltpu.PrefetchScalarGridSpec(
            num_scalar_prefetch=0,
            grid=(rows_p // tr_eff,),
            in_specs=[pl.BlockSpec((R, tr_eff, lane_w), lambda i: (0, i, 0))],
            out_specs=pl.BlockSpec((tr_eff, lane_w), lambda i: (i, 0)),
        ),
        compiler_params=pltpu.CompilerParams(
            dimension_semantics=("parallel",),
            vmem_limit_bytes=48 * 1024 * 1024,
        ),
    )(x_p)
    return out.reshape(-1)[:L]


# ----------------------------------------------------------------------------
# Layer wrappers (glue in plain JAX; hot path in Pallas).  NHWC layout.
# ----------------------------------------------------------------------------

def conv2d_relu_nhwc(x, w, b):
    """Valid conv, stride 1, + bias + ReLU.  x: (N, H, W, C), w: (Cout, Cin, kh, kw)."""
    N, H, W, C = x.shape
    Cout, Cin, kh, kw = w.shape
    assert C == Cin
    Ho, Wo = H - kh + 1, W - kw + 1
    # im2col: patch columns ordered as (kh, kw, Cin); weights are reordered to match.
    cols = [x[:, i:i + Ho, j:j + Wo, :] for i in range(kh) for j in range(kw)]
    p = jnp.stack(cols, axis=3).reshape(N * Ho * Wo, kh * kw * Cin)
    w2 = w.transpose(2, 3, 1, 0).reshape(kh * kw * Cin, Cout)   # (kh*kw*Cin, Cout)
    K = kh * kw * Cin
    tm = 1024 if K <= 64 else 512     # big M tiles when K is tiny (conv1)
    y = matmul_bias(p, w2, b, relu=True, tm=tm, tn=256)
    return y.reshape(N, Ho, Wo, Cout)                            # stays NHWC


def maxpool2d_nhwc(x, k):
    """Non-overlapping max pool k x k, stride k, floor mode (PyTorch default)."""
    N, H, W, C = x.shape
    Ho, Wo = H // k, W // k
    xc = x[:, :Ho * k, :Wo * k, :]
    slices = [xc[:, i::k, j::k, :] for i in range(k) for j in range(k)]
    stacked = jnp.stack(slices, axis=0).reshape(k * k, N * Ho * Wo * C)
    pooled = _pool_max_rows(stacked)
    return pooled.reshape(N, Ho, Wo, C)


def linear(x, w, b, *, relu):
    """x: (N, K), w: (out, K) (PyTorch layout), b: (out,)."""
    return matmul_bias(x, w.T, b, relu=relu, tm=512, tn=256)


# ----------------------------------------------------------------------------
# Parameters (deterministic synthetic init)
# ----------------------------------------------------------------------------

def _init_conv(key, cout, cin, kh, kw):
    kw_, kb_ = jax.random.split(key)
    fan_in = cin * kh * kw
    scale = 1.0 / jnp.sqrt(jnp.float32(fan_in))
    w = jax.random.uniform(kw_, (cout, cin, kh, kw), jnp.float32, -scale, scale)
    b = jax.random.uniform(kb_, (cout,), jnp.float32, -scale, scale)
    return w, b


def _init_linear(key, out_f, in_f):
    kw_, kb_ = jax.random.split(key)
    scale = 1.0 / jnp.sqrt(jnp.float32(in_f))
    w = jax.random.uniform(kw_, (out_f, in_f), jnp.float32, -scale, scale)
    b = jax.random.uniform(kb_, (out_f,), jnp.float32, -scale, scale)
    return w, b


def init_params(key):
    keys = jax.random.split(key, 7)
    params = {
        "conv1": _init_conv(keys[0], 32, 1, 4, 4),
        "conv2": _init_conv(keys[1], 64, 32, 3, 3),
        "conv3": _init_conv(keys[2], 128, 64, 2, 2),
        "conv4": _init_conv(keys[3], 256, 128, 1, 1),
        "lin1": _init_linear(keys[4], 1000, 256 * 6 * 6),
        "lin2": _init_linear(keys[5], 1000, 1000),
        "lin3": _init_linear(keys[6], 68 * 2, 1000),
    }
    return params


# ----------------------------------------------------------------------------
# Forward pass (matches PyTorch Net.forward; dropout = identity)
# ----------------------------------------------------------------------------

def net_forward(params, x):
    # x: (N, 1, 224, 224) NCHW at the module boundary -> NHWC internally.
    x = x.transpose(0, 2, 3, 1)                                        # (N,224,224,1)
    x = maxpool2d_nhwc(conv2d_relu_nhwc(x, *params["conv1"]), 4)       # (N,55,55,32)
    x = maxpool2d_nhwc(conv2d_relu_nhwc(x, *params["conv2"]), 2)       # (N,26,26,64)
    x = maxpool2d_nhwc(conv2d_relu_nhwc(x, *params["conv3"]), 2)       # (N,12,12,128)
    x = maxpool2d_nhwc(conv2d_relu_nhwc(x, *params["conv4"]), 2)       # (N,6,6,256)
    # PyTorch flattens NCHW (channel-major): transpose the small tensor back.
    x = x.transpose(0, 3, 1, 2).reshape(x.shape[0], -1)                # (N, 9216)
    x = linear(x, *params["lin1"], relu=True)                          # (N, 1000)
    x = linear(x, *params["lin2"], relu=False)                         # (N, 1000)
    x = linear(x, *params["lin3"], relu=False)                         # (N, 136)
    return x


# ----------------------------------------------------------------------------
# Main
# ----------------------------------------------------------------------------

if __name__ == "__main__":
    key = jax.random.PRNGKey(0)
    k_param, k_in = jax.random.split(key)
    params = init_params(k_param)

    # Input spatial size is constrained by lin1 (256*6*6 features after the
    # pools), so it must be 224x224; batch kept small.
    x = jax.random.normal(k_in, (2, 1, 224, 224), dtype=jnp.float32)

    out = net_forward(params, x)
    out = jax.block_until_ready(out)
    assert out.shape == (2, 136), out.shape
    assert jnp.all(jnp.isfinite(out))
    print("KERNEL_OK")
</pallas_src>

<mosaic_0001>
module attributes {stable_mosaic.version = 11 : i64} {
  func.func @_matmul_bias_kernel(%arg0: i32, %arg1: i32, %arg2: memref<1024x16xbf16, #tpu.memory_space<vmem>>, %arg3: memref<16x32xbf16, #tpu.memory_space<vmem>>, %arg4: memref<1x32xf32, #tpu.memory_space<vmem>>, %arg5: memref<1024x32xf32, #tpu.memory_space<vmem>>) attributes {dimension_semantics = [#tpu.dimension_semantics<parallel>, #tpu.dimension_semantics<parallel>], iteration_bounds = array<i64: 96, 1>, scalar_prefetch = 0 : i64, scratch_operands = 0 : i64, tpu.core_type = #tpu.core_type<tc>, window_params = [{transform_indices = @transform_0, window_bounds = array<i64: 1024, 16>}, {transform_indices = @transform_1, window_bounds = array<i64: 16, 32>}, {transform_indices = @transform_2, window_bounds = array<i64: 1, 32>}, {transform_indices = @transform_3, window_bounds = array<i64: 1024, 32>}]} {
    %c0 = arith.constant 0 : index
    %c0_0 = arith.constant 0 : index
    %0 = vector.load %arg2[%c0, %c0_0] : memref<1024x16xbf16, #tpu.memory_space<vmem>>, vector<1024x16xbf16>
    %c0_1 = arith.constant 0 : index
    %c0_2 = arith.constant 0 : index
    %1 = vector.load %arg3[%c0_1, %c0_2] : memref<16x32xbf16, #tpu.memory_space<vmem>>, vector<16x32xbf16>
    %cst = arith.constant dense<0.000000e+00> : vector<1024x32xf32>
    %2 = tpu.matmul %0, %1, %cst {dimension_numbers = #tpu.dot_dimension_numbers<[1], [0], [0], [1], [0, 0, 1, 1], [], []>} : vector<1024x16xbf16>, vector<16x32xbf16>, vector<1024x32xf32> -> vector<1024x32xf32>
    %c0_3 = arith.constant 0 : index
    %c0_4 = arith.constant 0 : index
    %3 = vector.load %arg4[%c0_3, %c0_4] : memref<1x32xf32, #tpu.memory_space<vmem>>, vector<1x32xf32>
    %4 = vector.broadcast %3 : vector<1x32xf32> to vector<1024x32xf32>
    %5 = arith.addf %2, %4 : vector<1024x32xf32>
    %cst_5 = arith.constant 0.000000e+00 : f32
    %6 = vector.broadcast %cst_5 : f32 to vector<1024x32xf32>
    %7 = arith.maximumf %5, %6 : vector<1024x32xf32>
    %c0_6 = arith.constant 0 : index
    %c0_7 = arith.constant 0 : index
    %8 = vector.load %arg5[%c0_6, %c0_7] : memref<1024x32xf32, #tpu.memory_space<vmem>>, vector<1024x32xf32>
    tpu.vector_store %arg5[%c0_6, %c0_7], %7 {strides = array<i32>} : memref<1024x32xf32, #tpu.memory_space<vmem>>, vector<1024x32xf32>,
    return
  }
  func.func @transform_0(%arg0: i32, %arg1: i32) -> (i32, i32) {
    %c0_i32 = arith.constant 0 : i32
    %c0_i32_0 = arith.constant 0 : i32
    return %arg0, %c0_i32 : i32, i32
  }
  func.func @transform_1(%arg0: i32, %arg1: i32) -> (i32, i32) {
    %c0_i32 = arith.constant 0 : i32
    %c0_i32_0 = arith.constant 0 : i32
    return %c0_i32, %arg1 : i32, i32
  }
  func.func @transform_2(%arg0: i32, %arg1: i32) -> (i32, i32) {
    %c0_i32 = arith.constant 0 : i32
    %c0_i32_0 = arith.constant 0 : i32
    return %c0_i32, %arg1 : i32, i32
  }
  func.func @transform_3(%arg0: i32, %arg1: i32) -> (i32, i32) {
    %c0_i32 = arith.constant 0 : i32
    return %arg0, %arg1 : i32, i32
  }
}

</mosaic_0001>

<bundles_post_ra>
// kernel: tpu_custom_call.1
= control target key start
LH: loop header
LB: loop body
LE: loop exit
PB: predicated region body
PF: predicated region fallthrough
CT: control target
= control target key end

     0   :  { %s2042_s12 = smov 0   ;;  %s2044_s13 = smov 0   ;;  %s2590_s0 = inlined_call_operand.vmem [shape: bf16[98304,16], index: 0, kind: input, shape index: {}]   ;;  %s2591_s1 = inlined_call_operand.vmem [shape: bf16[16,32], index: 1, kind: input, shape index: {}]   ;;  %s2592_s2 = inlined_call_operand.vmem [shape: f32[1,32], index: 2, kind: input, shape index: {}]   ;;  %s2593_s3 = inlined_call_operand.vmem [shape: f32[98304,32], index: 3, kind: output, shape index: {}]  }
   0x1   :  { %s2046_s14 = smov 0  }
   0x2 LB: > { %s25_s15 = sadd.s32 1, %s2016_s13  ;;  %p1573_p0 = scmp.ge.s32.totalorder %s2020_s14, 1  ;;  %s2020_s14 = sphi %s2046_s14, %s13_s14   ;;  %s2016_s13 = sphi %s2044_s13, %s2595_s13   ;;  %s2012_s12 = sphi %s2042_s12, %s2594_s12  }
   0x3   : > { %p27_p1 = scmp.ge.s32.totalorder %s25_s15, 96  ;;  %p169_p2 = scmp.lt.s32.totalorder %s2020_s14, 97 }
   0x5   : > { %s2597_s15 = smov (%p27_p1, %s25_s15), 0  ;;  %p170_p3 = pnand %p1573_p0, %p169_p2 }
   0x6   : > { %s1574_s18 = sshll.u32 (!%p170_p3), %s2012_s12, 7 }
   0x7   : > { %173 = sbr.rel (%p170_p3) target bundleno = 404 (0x194), region = 32  ;;  %p204_p4 = scmp.lt.s32.totalorder (!%p170_p3), %s1574_s18, 12287 }
   0xc   : > { %v1968_v0 = vld [vmem:[%s2591_s1] sm:$0xff]  ;;  %s2599_s18 = smov (!%p204_p4, %s1574_s18), 12287  ;;  %vm686_vm0 = vcmask 130048   ;;  %vm1336_vm1 = vcmask 261120  }
   0xd   : > { %886 = vmatpush.bf16.msra.mxu0 %v1968_v0  ;;  %1969 = vmatpush.bf16.msra.mxu1 %v1968_v0  ;;  %s1575_s19 = sshll.u32 %s2599_s18, 2  ;;  %v2138_v33 = vld [vmem:[%s2592_s2] ss:$0 sm:$0xff]  ;;  %s1577_s25 = sshll.u32 %s2599_s18, 3 }
   0xe   : > { %1970 = vmatpush.bf16.msra.mxu2 %v1968_v0  ;;  %1971 = vmatpush.bf16.msra.mxu3 %v1968_v0  ;;  %s2069_s22 = scalar_lea.vmem %s2590_s0, %s1575_s19  ;;  %s2150_s28 = scalar_lea.vmem %s2593_s3, %s1577_s25 }
   0xf   : > { %v1904_v1 = vld [vmem:[%s2069_s22] sm:$0xff]  ;;  %v1905_v5 = vld [vmem:[%s2069_s22 + $0x8] sm:$0xff]  ;;  %v1906_v9 = vld [vmem:[%s2069_s22 + $0x10] sm:$0xff] }
  0x10   : > { %v1920_v2 = vld [vmem:[%s2069_s22 + $0x80] sm:$0xff]  ;;  %1838 = vmatmul.msk.bf16.vlgmr.msra.gmra.mxu0 %vm686_vm0, %v1904_v1  ;;  %v1921_v6 = vld [vmem:[%s2069_s22 + $0x88] sm:$0xff]  ;;  %v1922_v10 = vld [vmem:[%s2069_s22 + $0x90] sm:$0xff] }
  0x11   : > { %v1936_v3 = vld [vmem:[%s2069_s22 + $0x100] sm:$0xff]  ;;  %1854 = vmatmul.msk.bf16.vlgmr.msra.gmra.mxu1 %vm686_vm0, %v1920_v2  ;;  %v1937_v7 = vld [vmem:[%s2069_s22 + $0x108] sm:$0xff]  ;;  %v1938_v11 = vld [vmem:[%s2069_s22 + $0x110] sm:$0xff] }
  0x12   : > { %v1952_v4 = vld [vmem:[%s2069_s22 + $0x180] sm:$0xff]  ;;  %1870 = vmatmul.msk.bf16.vlgmr.msra.gmra.mxu2 %vm686_vm0, %v1936_v3  ;;  %v1953_v8 = vld [vmem:[%s2069_s22 + $0x188] sm:$0xff]  ;;  %v1954_v12 = vld [vmem:[%s2069_s22 + $0x190] sm:$0xff] }
  0x13   : > { %1886 = vmatmul.msk.bf16.vlgmr.msra.gmra.mxu3 %vm686_vm0, %v1952_v4  ;;  %v1907_v13 = vld [vmem:[%s2069_s22 + $0x18] sm:$0xff]  ;;  %v1908_v17 = vld [vmem:[%s2069_s22 + $0x20] sm:$0xff]  ;;  %v1909_v21 = vld [vmem:[%s2069_s22 + $0x28] sm:$0xff] }
  0x14   : > { %v1923_v14 = vld [vmem:[%s2069_s22 + $0x98] sm:$0xff]  ;;  %v1924_v18 = vld [vmem:[%s2069_s22 + $0xa0] sm:$0xff]  ;;  %v1925_v22 = vld [vmem:[%s2069_s22 + $0xa8] sm:$0xff] }
  0x15   : > { %v1939_v15 = vld [vmem:[%s2069_s22 + $0x118] sm:$0xff]  ;;  %v1940_v19 = vld [vmem:[%s2069_s22 + $0x120] sm:$0xff]  ;;  %v1941_v23 = vld [vmem:[%s2069_s22 + $0x128] sm:$0xff] }
  0x16   : > { %v1955_v16 = vld [vmem:[%s2069_s22 + $0x198] sm:$0xff]  ;;  %v1956_v20 = vld [vmem:[%s2069_s22 + $0x1a0] sm:$0xff]  ;;  %v1957_v24 = vld [vmem:[%s2069_s22 + $0x1a8] sm:$0xff] }
  0x17   : > { %v1910_v25 = vld [vmem:[%s2069_s22 + $0x30] sm:$0xff]  ;;  %v1911_v29 = vld [vmem:[%s2069_s22 + $0x38] sm:$0xff]  ;;  %v1912_v34 = vld [vmem:[%s2069_s22 + $0x40] sm:$0xff] }
  0x18   : > { %v1926_v26 = vld [vmem:[%s2069_s22 + $0xb0] sm:$0xff]  ;;  %v1927_v30 = vld [vmem:[%s2069_s22 + $0xb8] sm:$0xff]  ;;  %v1928_v35 = vld [vmem:[%s2069_s22 + $0xc0] sm:$0xff] }
  0x19   : > { %v1942_v27 = vld [vmem:[%s2069_s22 + $0x130] sm:$0xff]  ;;  %v1943_v31 = vld [vmem:[%s2069_s22 + $0x138] sm:$0xff]  ;;  %v1944_v38 = vld [vmem:[%s2069_s22 + $0x140] sm:$0xff] }
  0x1a   : > { %v1958_v28 = vld [vmem:[%s2069_s22 + $0x1b0] sm:$0xff]  ;;  %v1959_v32 = vld [vmem:[%s2069_s22 + $0x1b8] sm:$0xff]  ;;  %v1960_v39 = vld [vmem:[%s2069_s22 + $0x1c0] sm:$0xff] }
  0x1b   : > { %v1913_v58 = vld [vmem:[%s2069_s22 + $0x48] sm:$0xff] }
  0x1c   : > { %v1929_v59 = vld [vmem:[%s2069_s22 + $0xc8] sm:$0xff] }
  0x1d   : > { %v1945_v0 = vld [vmem:[%s2069_s22 + $0x148] sm:$0xff] }
  0x1e   : > { %v1961_v1 = vld [vmem:[%s2069_s22 + $0x1c8] sm:$0xff] }
  0x20   : > { %1839 = vmatmul.msk.bf16.gmra.mxu0 %vm686_vm0, %v1905_v5 }
  0x21   : > { %1855 = vmatmul.msk.bf16.gmra.mxu1 %vm686_vm0, %v1921_v6 }
  0x22   : > { %1871 = vmatmul.msk.bf16.gmra.mxu2 %vm686_vm0, %v1937_v7 }
  0x23   : > { %1887 = vmatmul.msk.bf16.gmra.mxu3 %vm686_vm0, %v1953_v8 }
  0x30   : > { %1840 = vmatmul.msk.bf16.gmra.mxu0 %vm686_vm0, %v1906_v9 }
  0x31   : > { %1856 = vmatmul.msk.bf16.gmra.mxu1 %vm686_vm0, %v1922_v10 }
  0x32   : > { %1872 = vmatmul.msk.bf16.gmra.mxu2 %vm686_vm0, %v1938_v11 }
  0x33   : > { %1888 = vmatmul.msk.bf16.gmra.mxu3 %vm686_vm0, %v1954_v12 }
  0x40   : > { %1841 = vmatmul.msk.bf16.gmra.mxu0 %vm686_vm0, %v1907_v13 }
  0x41   : > { %1857 = vmatmul.msk.bf16.gmra.mxu1 %vm686_vm0, %v1923_v14 }
  0x42   : > { %1873 = vmatmul.msk.bf16.gmra.mxu2 %vm686_vm0, %v1939_v15 }
  0x43   : > { %1889 = vmatmul.msk.bf16.gmra.mxu3 %vm686_vm0, %v1955_v16 }
  0x50   : > { %1842 = vmatmul.msk.bf16.gmra.mxu0 %vm686_vm0, %v1908_v17 }
  0x51   : > { %1858 = vmatmul.msk.bf16.gmra.mxu1 %vm686_vm0, %v1924_v18 }
  0x52   : > { %1874 = vmatmul.msk.bf16.gmra.mxu2 %vm686_vm0, %v1940_v19 }
  0x53   : > { %1890 = vmatmul.msk.bf16.gmra.mxu3 %vm686_vm0, %v1956_v20 }
  0x60   : > { %1843 = vmatmul.msk.bf16.gmra.mxu0 %vm686_vm0, %v1909_v21 }
  0x61   : > { %1859 = vmatmul.msk.bf16.gmra.mxu1 %vm686_vm0, %v1925_v22  ;;  %v1914_v22 = vld [vmem:[%s2069_s22 + $0x50] sm:$0xff] }
  0x62   : > { %1875 = vmatmul.msk.bf16.gmra.mxu2 %vm686_vm0, %v1941_v23  ;;  %v1930_v23 = vld [vmem:[%s2069_s22 + $0xd0] sm:$0xff] }
  0x63   : > { %1891 = vmatmul.msk.bf16.gmra.mxu3 %vm686_vm0, %v1957_v24 }
  0x70   : > { %1844 = vmatmul.msk.bf16.gmra.mxu0 %vm686_vm0, %v1910_v25 }
  0x71   : > { %1860 = vmatmul.msk.bf16.gmra.mxu1 %vm686_vm0, %v1926_v26 }
  0x72   : > { %1876 = vmatmul.msk.bf16.gmra.mxu2 %vm686_vm0, %v1942_v27 }
  0x73   : > { %1892 = vmatmul.msk.bf16.gmra.mxu3 %vm686_vm0, %v1958_v28  ;;  %v1946_v28 = vld [vmem:[%s2069_s22 + $0x150] sm:$0xff] }
  0x80   : > { %1845 = vmatmul.msk.bf16.gmra.mxu0 %vm686_vm0, %v1911_v29  ;;  %v1962_v29 = vld [vmem:[%s2069_s22 + $0x1d0] sm:$0xff] }
  0x81   : > { %1861 = vmatmul.msk.bf16.gmra.mxu1 %vm686_vm0, %v1927_v30 }
  0x82   : > { %1877 = vmatmul.msk.bf16.gmra.mxu2 %vm686_vm0, %v1943_v31 }
  0x83   : > { %1893 = vmatmul.msk.bf16.gmra.mxu3 %vm686_vm0, %v1959_v32 }
  0x8d   : > { %v888_v36 = vpop.f32.mrf.mxu0 }
  0x8e   : > { %v968_v37 = vpop.f32.mrf.mxu1  ;;  %v889_v40 = vadd.f32 %v2138_v33, %v888_v36 }
  0x8f   : > { %v969_v41 = vadd.f32 %v2138_v33, %v968_v37 }
  0x90   : > { %v1208_v42 = vmax.f32 %v889_v40, 0.0  ;;  %1846 = vmatmul.msk.bf16.gmra.mxu0 %vm686_vm0, %v1912_v34 }
  0x91   : > { %v1240_v43 = vmax.f32 %v969_v41, 0.0  ;;  %1862 = vmatmul.msk.bf16.gmra.mxu1 %vm686_vm0, %v1928_v35 }
  0x92   : > { %1878 = vmatmul.msk.bf16.gmra.mxu2 %vm686_vm0, %v1944_v38  ;;  %1337 = vst.msk [vmem:[%s2150_s28] sm:$0xff] %vm1336_vm1, %v1208_v42 }
  0x93   : > { %1894 = vmatmul.msk.bf16.gmra.mxu3 %vm686_vm0, %v1960_v39  ;;  %1369 = vst.msk [vmem:[%s2150_s28 + $0x100] sm:$0xff] %vm1336_vm1, %v1240_v43 }
  0x95   : > { %v1048_v44 = vpop.f32.mrf.mxu2  ;;  %v890_v48 = vpop.f32.mrf.mxu0 }
  0x96   : > { %v1128_v45 = vpop.f32.mrf.mxu3  ;;  %v1049_v46 = vadd.f32 %v2138_v33, %v1048_v44  ;;  %v970_v49 = vpop.f32.mrf.mxu1  ;;  %v891_v50 = vadd.f32 %v2138_v33, %v890_v48 }
  0x97   : > { %v1129_v47 = vadd.f32 %v2138_v33, %v1128_v45  ;;  %v971_v51 = vadd.f32 %v2138_v33, %v970_v49 }
  0x98   : > { %v1272_v52 = vmax.f32 %v1049_v46, 0.0  ;;  %v1209_v54 = vmax.f32 %v891_v50, 0.0 }
  0x99   : > { %v1304_v53 = vmax.f32 %v1129_v47, 0.0  ;;  %v1241_v55 = vmax.f32 %v971_v51, 0.0  ;;  %v1915_v51 = vld [vmem:[%s2069_s22 + $0x58] sm:$0xff] }
  0x9a   : > { %1401 = vst.msk [vmem:[%s2150_s28 + $0x200] sm:$0xff] %vm1336_vm1, %v1272_v52  ;;  %v1931_v52 = vld [vmem:[%s2069_s22 + $0xd8] sm:$0xff] }
  0x9b   : > { %1433 = vst.msk [vmem:[%s2150_s28 + $0x300] sm:$0xff] %vm1336_vm1, %v1304_v53 }
  0x9c   : > { %1338 = vst.msk [vmem:[%s2150_s28 + $0x8] sm:$0xff] %vm1336_vm1, %v1209_v54 }
  0x9d   : > { %1370 = vst.msk [vmem:[%s2150_s28 + $0x108] sm:$0xff] %vm1336_vm1, %v1241_v55  ;;  %v1050_v56 = vpop.f32.mrf.mxu2  ;;  %v893_v62 = vpop.f32.mrf.mxu0 }
  0x9e   : > { %v1130_v57 = vpop.f32.mrf.mxu3  ;;  %v1051_v60 = vadd.f32 %v2138_v33, %v1050_v56  ;;  %v973_v63 = vpop.f32.mrf.mxu1  ;;  %v894_v2 = vadd.f32 %v2138_v33, %v893_v62 }
  0x9f   : > { %v1131_v61 = vadd.f32 %v2138_v33, %v1130_v57  ;;  %v974_v3 = vadd.f32 %v2138_v33, %v973_v63  ;;  %v1947_v57 = vld [vmem:[%s2069_s22 + $0x158] sm:$0xff] }
  0xa0   : > { %v1273_v4 = vmax.f32 %v1051_v60, 0.0  ;;  %v1210_v6 = vmax.f32 %v894_v2, 0.0  ;;  %1847 = vmatmul.msk.bf16.gmra.mxu0 %vm686_vm0, %v1913_v58  ;;  %v1963_v58 = vld [vmem:[%s2069_s22 + $0x1d8] sm:$0xff] }
  0xa1   : > { %v1305_v5 = vmax.f32 %v1131_v61, 0.0  ;;  %v1242_v7 = vmax.f32 %v974_v3, 0.0  ;;  %1863 = vmatmul.msk.bf16.gmra.mxu1 %vm686_vm0, %v1929_v59 }
  0xa2   : > { %1402 = vst.msk [vmem:[%s2150_s28 + $0x208] sm:$0xff] %vm1336_vm1, %v1273_v4  ;;  %1879 = vmatmul.msk.bf16.gmra.mxu2 %vm686_vm0, %v1945_v0 }
  0xa3   : > { %1895 = vmatmul.msk.bf16.gmra.mxu3 %vm686_vm0, %v1961_v1  ;;  %1434 = vst.msk [vmem:[%s2150_s28 + $0x308] sm:$0xff] %vm1336_vm1, %v1305_v5 }
  0xa4   : > { %1339 = vst.msk [vmem:[%s2150_s28 + $0x10] sm:$0xff] %vm1336_vm1, %v1210_v6 }
  0xa5   : > { %1371 = vst.msk [vmem:[%s2150_s28 + $0x110] sm:$0xff] %vm1336_vm1, %v1242_v7  ;;  %v1053_v8 = vpop.f32.mrf.mxu2  ;;  %v895_v12 = vpop.f32.mrf.mxu0 }
  0xa6   : > { %v1133_v9 = vpop.f32.mrf.mxu3  ;;  %v1054_v10 = vadd.f32 %v2138_v33, %v1053_v8  ;;  %v975_v13 = vpop.f32.mrf.mxu1  ;;  %v896_v14 = vadd.f32 %v2138_v33, %v895_v12 }
  0xa7   : > { %v1134_v11 = vadd.f32 %v2138_v33, %v1133_v9  ;;  %v976_v15 = vadd.f32 %v2138_v33, %v975_v13 }
  0xa8   : > { %v1274_v16 = vmax.f32 %v1054_v10, 0.0  ;;  %v1211_v18 = vmax.f32 %v896_v14, 0.0 }
  0xa9   : > { %v1306_v17 = vmax.f32 %v1134_v11, 0.0  ;;  %v1243_v19 = vmax.f32 %v976_v15, 0.0  ;;  %v1916_v15 = vld [vmem:[%s2069_s22 + $0x60] sm:$0xff] }
  0xaa   : > { %1403 = vst.msk [vmem:[%s2150_s28 + $0x210] sm:$0xff] %vm1336_vm1, %v1274_v16  ;;  %v1932_v16 = vld [vmem:[%s2069_s22 + $0xe0] sm:$0xff] }
  0xab   : > { %1435 = vst.msk [vmem:[%s2150_s28 + $0x310] sm:$0xff] %vm1336_vm1, %v1306_v17 }
  0xac   : > { %1340 = vst.msk [vmem:[%s2150_s28 + $0x18] sm:$0xff] %vm1336_vm1, %v1211_v18 }
  0xad   : > { %1372 = vst.msk [vmem:[%s2150_s28 + $0x118] sm:$0xff] %vm1336_vm1, %v1243_v19  ;;  %v1055_v20 = vpop.f32.mrf.mxu2  ;;  %v898_v26 = vpop.f32.mrf.mxu0 }
  0xae   : > { %v1135_v21 = vpop.f32.mrf.mxu3  ;;  %v1056_v24 = vadd.f32 %v2138_v33, %v1055_v20  ;;  %v978_v27 = vpop.f32.mrf.mxu1  ;;  %v899_v30 = vadd.f32 %v2138_v33, %v898_v26 }
  0xaf   : > { %v1136_v25 = vadd.f32 %v2138_v33, %v1135_v21  ;;  %v979_v31 = vadd.f32 %v2138_v33, %v978_v27  ;;  %v1948_v21 = vld [vmem:[%s2069_s22 + $0x160] sm:$0xff] }
  0xb0   : > { %v1275_v32 = vmax.f32 %v1056_v24, 0.0  ;;  %v1212_v35 = vmax.f32 %v899_v30, 0.0  ;;  %1848 = vmatmul.msk.bf16.gmra.mxu0 %vm686_vm0, %v1914_v22  ;;  %v1964_v22 = vld [vmem:[%s2069_s22 + $0x1e0] sm:$0xff] }
  0xb1   : > { %v1307_v34 = vmax.f32 %v1136_v25, 0.0  ;;  %v1244_v36 = vmax.f32 %v979_v31, 0.0  ;;  %1864 = vmatmul.msk.bf16.gmra.mxu1 %vm686_vm0, %v1930_v23 }
  0xb2   : > { %1404 = vst.msk [vmem:[%s2150_s28 + $0x218] sm:$0xff] %vm1336_vm1, %v1275_v32  ;;  %1880 = vmatmul.msk.bf16.gmra.mxu2 %vm686_vm0, %v1946_v28 }
  0xb3   : > { %1896 = vmatmul.msk.bf16.gmra.mxu3 %vm686_vm0, %v1962_v29  ;;  %1436 = vst.msk [vmem:[%s2150_s28 + $0x318] sm:$0xff] %vm1336_vm1, %v1307_v34 }
  0xb4   : > { %1341 = vst.msk [vmem:[%s2150_s28 + $0x20] sm:$0xff] %vm1336_vm1, %v1212_v35 }
  0xb5   : > { %1373 = vst.msk [vmem:[%s2150_s28 + $0x120] sm:$0xff] %vm1336_vm1, %v1244_v36  ;;  %v1058_v37 = vpop.f32.mrf.mxu2  ;;  %v900_v41 = vpop.f32.mrf.mxu0 }
  0xb6   : > { %v1138_v38 = vpop.f32.mrf.mxu3  ;;  %v1059_v39 = vadd.f32 %v2138_v33, %v1058_v37  ;;  %v980_v42 = vpop.f32.mrf.mxu1  ;;  %v901_v43 = vadd.f32 %v2138_v33, %v900_v41 }
  0xb7   : > { %v1139_v40 = vadd.f32 %v2138_v33, %v1138_v38  ;;  %v981_v44 = vadd.f32 %v2138_v33, %v980_v42 }
  0xb8   : > { %v1276_v45 = vmax.f32 %v1059_v39, 0.0  ;;  %v1213_v47 = vmax.f32 %v901_v43, 0.0 }
  0xb9   : > { %v1308_v46 = vmax.f32 %v1139_v40, 0.0  ;;  %v1245_v48 = vmax.f32 %v981_v44, 0.0  ;;  %v1917_v44 = vld [vmem:[%s2069_s22 + $0x68] sm:$0xff] }
  0xba   : > { %1405 = vst.msk [vmem:[%s2150_s28 + $0x220] sm:$0xff] %vm1336_vm1, %v1276_v45  ;;  %v1933_v45 = vld [vmem:[%s2069_s22 + $0xe8] sm:$0xff] }
  0xbb   : > { %1437 = vst.msk [vmem:[%s2150_s28 + $0x320] sm:$0xff] %vm1336_vm1, %v1308_v46 }
  0xbc   : > { %1342 = vst.msk [vmem:[%s2150_s28 + $0x28] sm:$0xff] %vm1336_vm1, %v1213_v47 }
  0xbd   : > { %1374 = vst.msk [vmem:[%s2150_s28 + $0x128] sm:$0xff] %vm1336_vm1, %v1245_v48  ;;  %v1060_v49 = vpop.f32.mrf.mxu2  ;;  %v903_v55 = vpop.f32.mrf.mxu0 }
  0xbe   : > { %v1140_v50 = vpop.f32.mrf.mxu3  ;;  %v1061_v53 = vadd.f32 %v2138_v33, %v1060_v49  ;;  %v983_v56 = vpop.f32.mrf.mxu1  ;;  %v904_v59 = vadd.f32 %v2138_v33, %v903_v55 }
  0xbf   : > { %v1141_v54 = vadd.f32 %v2138_v33, %v1140_v50  ;;  %v984_v60 = vadd.f32 %v2138_v33, %v983_v56  ;;  %v1949_v50 = vld [vmem:[%s2069_s22 + $0x168] sm:$0xff] }
  0xc0   : > { %v1277_v61 = vmax.f32 %v1061_v53, 0.0  ;;  %v1214_v63 = vmax.f32 %v904_v59, 0.0  ;;  %1849 = vmatmul.msk.bf16.gmra.mxu0 %vm686_vm0, %v1915_v51  ;;  %v1965_v51 = vld [vmem:[%s2069_s22 + $0x1e8] sm:$0xff] }
  0xc1   : > { %v1309_v62 = vmax.f32 %v1141_v54, 0.0  ;;  %v1246_v0 = vmax.f32 %v984_v60, 0.0  ;;  %1865 = vmatmul.msk.bf16.gmra.mxu1 %vm686_vm0, %v1931_v52 }
  0xc2   : > { %1406 = vst.msk [vmem:[%s2150_s28 + $0x228] sm:$0xff] %vm1336_vm1, %v1277_v61  ;;  %1881 = vmatmul.msk.bf16.gmra.mxu2 %vm686_vm0, %v1947_v57 }
  0xc3   : > { %1897 = vmatmul.msk.bf16.gmra.mxu3 %vm686_vm0, %v1963_v58  ;;  %1438 = vst.msk [vmem:[%s2150_s28 + $0x328] sm:$0xff] %vm1336_vm1, %v1309_v62 }
  0xc4   : > { %1343 = vst.msk [vmem:[%s2150_s28 + $0x30] sm:$0xff] %vm1336_vm1, %v1214_v63 }
  0xc5   : > { %1375 = vst.msk [vmem:[%s2150_s28 + $0x130] sm:$0xff] %vm1336_vm1, %v1246_v0  ;;  %v1063_v1 = vpop.f32.mrf.mxu2  ;;  %v905_v5 = vpop.f32.mrf.mxu0 }
  0xc6   : > { %v1143_v2 = vpop.f32.mrf.mxu3  ;;  %v1064_v3 = vadd.f32 %v2138_v33, %v1063_v1  ;;  %v985_v6 = vpop.f32.mrf.mxu1  ;;  %v906_v7 = vadd.f32 %v2138_v33, %v905_v5 }
  0xc7   : > { %v1144_v4 = vadd.f32 %v2138_v33, %v1143_v2  ;;  %v986_v8 = vadd.f32 %v2138_v33, %v985_v6 }
  0xc8   : > { %v1278_v9 = vmax.f32 %v1064_v3, 0.0  ;;  %v1215_v11 = vmax.f32 %v906_v7, 0.0 }
  0xc9   : > { %v1310_v10 = vmax.f32 %v1144_v4, 0.0  ;;  %v1247_v12 = vmax.f32 %v986_v8, 0.0  ;;  %v1918_v8 = vld [vmem:[%s2069_s22 + $0x70] sm:$0xff] }
  0xca   : > { %1407 = vst.msk [vmem:[%s2150_s28 + $0x230] sm:$0xff] %vm1336_vm1, %v1278_v9  ;;  %v1934_v9 = vld [vmem:[%s2069_s22 + $0xf0] sm:$0xff] }
  0xcb   : > { %1439 = vst.msk [vmem:[%s2150_s28 + $0x330] sm:$0xff] %vm1336_vm1, %v1310_v10 }
  0xcc   : > { %1344 = vst.msk [vmem:[%s2150_s28 + $0x38] sm:$0xff] %vm1336_vm1, %v1215_v11 }
  0xcd   : > { %1376 = vst.msk [vmem:[%s2150_s28 + $0x138] sm:$0xff] %vm1336_vm1, %v1247_v12  ;;  %v1065_v13 = vpop.f32.mrf.mxu2  ;;  %v908_v19 = vpop.f32.mrf.mxu0 }
  0xce   : > { %v1145_v14 = vpop.f32.mrf.mxu3  ;;  %v1066_v17 = vadd.f32 %v2138_v33, %v1065_v13  ;;  %v988_v20 = vpop.f32.mrf.mxu1  ;;  %v909_v23 = vadd.f32 %v2138_v33, %v908_v19 }
  0xcf   : > { %v1146_v18 = vadd.f32 %v2138_v33, %v1145_v14  ;;  %v989_v24 = vadd.f32 %v2138_v33, %v988_v20  ;;  %v1950_v14 = vld [vmem:[%s2069_s22 + $0x170] sm:$0xff] }
  0xd0   : > { %v1279_v25 = vmax.f32 %v1066_v17, 0.0  ;;  %v1216_v27 = vmax.f32 %v909_v23, 0.0  ;;  %1850 = vmatmul.msk.bf16.gmra.mxu0 %vm686_vm0, %v1916_v15  ;;  %v1966_v15 = vld [vmem:[%s2069_s22 + $0x1f0] sm:$0xff] }
  0xd1   : > { %v1311_v26 = vmax.f32 %v1146_v18, 0.0  ;;  %v1248_v28 = vmax.f32 %v989_v24, 0.0  ;;  %1866 = vmatmul.msk.bf16.gmra.mxu1 %vm686_vm0, %v1932_v16 }
  0xd2   : > { %1408 = vst.msk [vmem:[%s2150_s28 + $0x238] sm:$0xff] %vm1336_vm1, %v1279_v25  ;;  %1882 = vmatmul.msk.bf16.gmra.mxu2 %vm686_vm0, %v1948_v21 }
  0xd3   : > { %1898 = vmatmul.msk.bf16.gmra.mxu3 %vm686_vm0, %v1964_v22  ;;  %1440 = vst.msk [vmem:[%s2150_s28 + $0x338] sm:$0xff] %vm1336_vm1, %v1311_v26 }
  0xd4   : > { %1345 = vst.msk [vmem:[%s2150_s28 + $0x40] sm:$0xff] %vm1336_vm1, %v1216_v27 }
  0xd5   : > { %1377 = vst.msk [vmem:[%s2150_s28 + $0x140] sm:$0xff] %vm1336_vm1, %v1248_v28  ;;  %v1068_v29 = vpop.f32.mrf.mxu2  ;;  %v910_v34 = vpop.f32.mrf.mxu0 }
  0xd6   : > { %v1148_v30 = vpop.f32.mrf.mxu3  ;;  %v1069_v31 = vadd.f32 %v2138_v33, %v1068_v29  ;;  %v990_v35 = vpop.f32.mrf.mxu1  ;;  %v911_v36 = vadd.f32 %v2138_v33, %v910_v34 }
  0xd7   : > { %v1149_v32 = vadd.f32 %v2138_v33, %v1148_v30  ;;  %v991_v37 = vadd.f32 %v2138_v33, %v990_v35 }
  0xd8   : > { %v1280_v38 = vmax.f32 %v1069_v31, 0.0  ;;  %v1217_v40 = vmax.f32 %v911_v36, 0.0 }
  0xd9   : > { %v1312_v39 = vmax.f32 %v1149_v32, 0.0  ;;  %v1249_v41 = vmax.f32 %v991_v37, 0.0  ;;  %v1919_v37 = vld [vmem:[%s2069_s22 + $0x78] sm:$0xff] }
  0xda   : > { %1409 = vst.msk [vmem:[%s2150_s28 + $0x240] sm:$0xff] %vm1336_vm1, %v1280_v38  ;;  %v1935_v38 = vld [vmem:[%s2069_s22 + $0xf8] sm:$0xff] }
  0xdb   : > { %1441 = vst.msk [vmem:[%s2150_s28 + $0x340] sm:$0xff] %vm1336_vm1, %v1312_v39 }
  0xdc   : > { %1346 = vst.msk [vmem:[%s2150_s28 + $0x48] sm:$0xff] %vm1336_vm1, %v1217_v40 }
  0xdd   : > { %1378 = vst.msk [vmem:[%s2150_s28 + $0x148] sm:$0xff] %vm1336_vm1, %v1249_v41  ;;  %v1070_v42 = vpop.f32.mrf.mxu2  ;;  %v913_v48 = vpop.f32.mrf.mxu0 }
  0xde   : > { %v1150_v43 = vpop.f32.mrf.mxu3  ;;  %v1071_v46 = vadd.f32 %v2138_v33, %v1070_v42  ;;  %v993_v49 = vpop.f32.mrf.mxu1  ;;  %v914_v52 = vadd.f32 %v2138_v33, %v913_v48 }
  0xdf   : > { %v1151_v47 = vadd.f32 %v2138_v33, %v1150_v43  ;;  %v994_v53 = vadd.f32 %v2138_v33, %v993_v49  ;;  %v1951_v43 = vld [vmem:[%s2069_s22 + $0x178] sm:$0xff] }
  0xe0   : > { %v1281_v54 = vmax.f32 %v1071_v46, 0.0  ;;  %v1218_v56 = vmax.f32 %v914_v52, 0.0  ;;  %1851 = vmatmul.msk.bf16.gmra.mxu0 %vm686_vm0, %v1917_v44  ;;  %v1967_v44 = vld [vmem:[%s2069_s22 + $0x1f8] sm:$0xff] }
  0xe1   : > { %v1313_v55 = vmax.f32 %v1151_v47, 0.0  ;;  %v1250_v57 = vmax.f32 %v994_v53, 0.0  ;;  %1867 = vmatmul.msk.bf16.gmra.mxu1 %vm686_vm0, %v1933_v45 }
  0xe2   : > { %1410 = vst.msk [vmem:[%s2150_s28 + $0x248] sm:$0xff] %vm1336_vm1, %v1281_v54  ;;  %1883 = vmatmul.msk.bf16.gmra.mxu2 %vm686_vm0, %v1949_v50 }
  0xe3   : > { %1899 = vmatmul.msk.bf16.gmra.mxu3 %vm686_vm0, %v1965_v51  ;;  %1442 = vst.msk [vmem:[%s2150_s28 + $0x348] sm:$0xff] %vm1336_vm1, %v1313_v55 }
  0xe4   : > { %1347 = vst.msk [vmem:[%s2150_s28 + $0x50] sm:$0xff] %vm1336_vm1, %v1218_v56 }
  0xe5   : > { %1379 = vst.msk [vmem:[%s2150_s28 + $0x150] sm:$0xff] %vm1336_vm1, %v1250_v57  ;;  %v1073_v58 = vpop.f32.mrf.mxu2  ;;  %v915_v62 = vpop.f32.mrf.mxu0 }
  0xe6   : > { %v1153_v59 = vpop.f32.mrf.mxu3  ;;  %v1074_v60 = vadd.f32 %v2138_v33, %v1073_v58  ;;  %v995_v63 = vpop.f32.mrf.mxu1  ;;  %v916_v0 = vadd.f32 %v2138_v33, %v915_v62 }
  0xe7   : > { %v1154_v61 = vadd.f32 %v2138_v33, %v1153_v59  ;;  %v996_v1 = vadd.f32 %v2138_v33, %v995_v63 }
  0xe8   : > { %v1282_v2 = vmax.f32 %v1074_v60, 0.0  ;;  %v1219_v4 = vmax.f32 %v916_v0, 0.0 }
  0xe9   : > { %v1314_v3 = vmax.f32 %v1154_v61, 0.0  ;;  %v1251_v5 = vmax.f32 %v996_v1, 0.0 }
  0xea   : > { %1411 = vst.msk [vmem:[%s2150_s28 + $0x250] sm:$0xff] %vm1336_vm1, %v1282_v2 }
  0xeb   : > { %1443 = vst.msk [vmem:[%s2150_s28 + $0x350] sm:$0xff] %vm1336_vm1, %v1314_v3 }
  0xec   : > { %1348 = vst.msk [vmem:[%s2150_s28 + $0x58] sm:$0xff] %vm1336_vm1, %v1219_v4 }
  0xed   : > { %1380 = vst.msk [vmem:[%s2150_s28 + $0x158] sm:$0xff] %vm1336_vm1, %v1251_v5  ;;  %v1075_v6 = vpop.f32.mrf.mxu2  ;;  %v918_v12 = vpop.f32.mrf.mxu0 }
  0xee   : > { %v1155_v7 = vpop.f32.mrf.mxu3  ;;  %v1076_v10 = vadd.f32 %v2138_v33, %v1075_v6  ;;  %v998_v13 = vpop.f32.mrf.mxu1  ;;  %v919_v16 = vadd.f32 %v2138_v33, %v918_v12 }
  0xef   : > { %v1156_v11 = vadd.f32 %v2138_v33, %v1155_v7  ;;  %v999_v17 = vadd.f32 %v2138_v33, %v998_v13 }
  0xf0   : > { %v1283_v18 = vmax.f32 %v1076_v10, 0.0  ;;  %v1220_v20 = vmax.f32 %v919_v16, 0.0  ;;  %1852 = vmatmul.msk.bf16.gmra.mxu0 %vm686_vm0, %v1918_v8 }
  0xf1   : > { %v1315_v19 = vmax.f32 %v1156_v11, 0.0  ;;  %v1252_v21 = vmax.f32 %v999_v17, 0.0  ;;  %1868 = vmatmul.msk.bf16.gmra.mxu1 %vm686_vm0, %v1934_v9 }
  0xf2   : > { %1412 = vst.msk [vmem:[%s2150_s28 + $0x258] sm:$0xff] %vm1336_vm1, %v1283_v18  ;;  %1884 = vmatmul.msk.bf16.gmra.mxu2 %vm686_vm0, %v1950_v14 }
  0xf3   : > { %1900 = vmatmul.msk.bf16.gmra.mxu3 %vm686_vm0, %v1966_v15  ;;  %1444 = vst.msk [vmem:[%s2150_s28 + $0x358] sm:$0xff] %vm1336_vm1, %v1315_v19 }
  0xf4   : > { %1349 = vst.msk [vmem:[%s2150_s28 + $0x60] sm:$0xff] %vm1336_vm1, %v1220_v20 }
  0xf5   : > { %1381 = vst.msk [vmem:[%s2150_s28 + $0x160] sm:$0xff] %vm1336_vm1, %v1252_v21  ;;  %v1078_v22 = vpop.f32.mrf.mxu2  ;;  %v920_v26 = vpop.f32.mrf.mxu0 }
  0xf6   : > { %v1158_v23 = vpop.f32.mrf.mxu3  ;;  %v1079_v24 = vadd.f32 %v2138_v33, %v1078_v22  ;;  %v1000_v27 = vpop.f32.mrf.mxu1  ;;  %v921_v28 = vadd.f32 %v2138_v33, %v920_v26 }
  0xf7   : > { %v1159_v25 = vadd.f32 %v2138_v33, %v1158_v23  ;;  %v1001_v29 = vadd.f32 %v2138_v33, %v1000_v27 }
  0xf8   : > { %v1284_v30 = vmax.f32 %v1079_v24, 0.0  ;;  %v1221_v32 = vmax.f32 %v921_v28, 0.0 }
  0xf9   : > { %v1316_v31 = vmax.f32 %v1159_v25, 0.0  ;;  %v1253_v34 = vmax.f32 %v1001_v29, 0.0 }
  0xfa   : > { %1413 = vst.msk [vmem:[%s2150_s28 + $0x260] sm:$0xff] %vm1336_vm1, %v1284_v30 }
  0xfb   : > { %1445 = vst.msk [vmem:[%s2150_s28 + $0x360] sm:$0xff] %vm1336_vm1, %v1316_v31 }
  0xfc   : > { %1350 = vst.msk [vmem:[%s2150_s28 + $0x68] sm:$0xff] %vm1336_vm1, %v1221_v32 }
  0xfd   : > { %1382 = vst.msk [vmem:[%s2150_s28 + $0x168] sm:$0xff] %vm1336_vm1, %v1253_v34  ;;  %v1080_v35 = vpop.f32.mrf.mxu2  ;;  %v923_v41 = vpop.f32.mrf.mxu0 }
  0xfe   : > { %v1160_v36 = vpop.f32.mrf.mxu3  ;;  %v1081_v39 = vadd.f32 %v2138_v33, %v1080_v35  ;;  %v1003_v42 = vpop.f32.mrf.mxu1  ;;  %v924_v45 = vadd.f32 %v2138_v33, %v923_v41 }
  0xff   : > { %v1161_v40 = vadd.f32 %v2138_v33, %v1160_v36  ;;  %v1004_v46 = vadd.f32 %v2138_v33, %v1003_v42 }
 0x100   : > { %v1285_v47 = vmax.f32 %v1081_v39, 0.0  ;;  %v1222_v49 = vmax.f32 %v924_v45, 0.0  ;;  %1853 = vmatmul.msk.bf16.gmra.mxu0 %vm686_vm0, %v1919_v37 }
 0x101   : > { %v1317_v48 = vmax.f32 %v1161_v40, 0.0  ;;  %v1254_v50 = vmax.f32 %v1004_v46, 0.0  ;;  %1869 = vmatmul.msk.bf16.gmra.mxu1 %vm686_vm0, %v1935_v38 }
 0x102   : > { %1414 = vst.msk [vmem:[%s2150_s28 + $0x268] sm:$0xff] %vm1336_vm1, %v1285_v47  ;;  %1885 = vmatmul.msk.bf16.gmra.mxu2 %vm686_vm0, %v1951_v43 }
 0x103   : > { %1901 = vmatmul.msk.bf16.gmra.mxu3 %vm686_vm0, %v1967_v44  ;;  %1446 = vst.msk [vmem:[%s2150_s28 + $0x368] sm:$0xff] %vm1336_vm1, %v1317_v48 }
 0x104   : > { %1351 = vst.msk [vmem:[%s2150_s28 + $0x70] sm:$0xff] %vm1336_vm1, %v1222_v49 }
 0x105   : > { %1383 = vst.msk [vmem:[%s2150_s28 + $0x170] sm:$0xff] %vm1336_vm1, %v1254_v50  ;;  %v1083_v51 = vpop.f32.mrf.mxu2  ;;  %v925_v55 = vpop.f32.mrf.mxu0 }
 0x106   : > { %v1163_v52 = vpop.f32.mrf.mxu3  ;;  %v1084_v53 = vadd.f32 %v2138_v33, %v1083_v51  ;;  %v1005_v56 = vpop.f32.mrf.mxu1  ;;  %v926_v57 = vadd.f32 %v2138_v33, %v925_v55 }
 0x107   : > { %v1164_v54 = vadd.f32 %v2138_v33, %v1163_v52  ;;  %v1006_v58 = vadd.f32 %v2138_v33, %v1005_v56 }
 0x108   : > { %v1286_v59 = vmax.f32 %v1084_v53, 0.0  ;;  %v1223_v61 = vmax.f32 %v926_v57, 0.0 }
 0x109   : > { %v1318_v60 = vmax.f32 %v1164_v54, 0.0  ;;  %v1255_v62 = vmax.f32 %v1006_v58, 0.0 }
 0x10a   : > { %1415 = vst.msk [vmem:[%s2150_s28 + $0x270] sm:$0xff] %vm1336_vm1, %v1286_v59 }
 0x10b   : > { %1447 = vst.msk [vmem:[%s2150_s28 + $0x370] sm:$0xff] %vm1336_vm1, %v1318_v60 }
 0x10c   : > { %1352 = vst.msk [vmem:[%s2150_s28 + $0x78] sm:$0xff] %vm1336_vm1, %v1223_v61 }
 0x10d   : > { %1384 = vst.msk [vmem:[%s2150_s28 + $0x178] sm:$0xff] %vm1336_vm1, %v1255_v62  ;;  %v1085_v63 = vpop.f32.mrf.mxu2  ;;  %v928_v3 = vpop.f32.mrf.mxu0 }
 0x10e   : > { %v1165_v0 = vpop.f32.mrf.mxu3  ;;  %v1086_v1 = vadd.f32 %v2138_v33, %v1085_v63  ;;  %v1008_v4 = vpop.f32.mrf.mxu1  ;;  %v929_v5 = vadd.f32 %v2138_v33, %v928_v3 }
 0x10f   : > { %v1166_v2 = vadd.f32 %v2138_v33, %v1165_v0  ;;  %v1009_v6 = vadd.f32 %v2138_v33, %v1008_v4 }
 0x110   : > { %v1287_v7 = vmax.f32 %v1086_v1, 0.0  ;;  %v1224_v9 = vmax.f32 %v929_v5, 0.0 }
 0x111   : > { %v1319_v8 = vmax.f32 %v1166_v2, 0.0  ;;  %v1256_v10 = vmax.f32 %v1009_v6, 0.0 }
 0x112   : > { %1416 = vst.msk [vmem:[%s2150_s28 + $0x278] sm:$0xff] %vm1336_vm1, %v1287_v7 }
 0x113   : > { %1448 = vst.msk [vmem:[%s2150_s28 + $0x378] sm:$0xff] %vm1336_vm1, %v1319_v8 }
 0x114   : > { %1353 = vst.msk [vmem:[%s2150_s28 + $0x80] sm:$0xff] %vm1336_vm1, %v1224_v9 }
 0x115   : > { %1385 = vst.msk [vmem:[%s2150_s28 + $0x180] sm:$0xff] %vm1336_vm1, %v1256_v10  ;;  %v1088_v11 = vpop.f32.mrf.mxu2  ;;  %v930_v15 = vpop.f32.mrf.mxu0 }
 0x116   : > { %v1168_v12 = vpop.f32.mrf.mxu3  ;;  %v1089_v13 = vadd.f32 %v2138_v33, %v1088_v11  ;;  %v1010_v16 = vpop.f32.mrf.mxu1  ;;  %v931_v17 = vadd.f32 %v2138_v33, %v930_v15 }
 0x117   : > { %v1169_v14 = vadd.f32 %v2138_v33, %v1168_v12  ;;  %v1011_v18 = vadd.f32 %v2138_v33, %v1010_v16 }
 0x118   : > { %v1288_v19 = vmax.f32 %v1089_v13, 0.0  ;;  %v1225_v21 = vmax.f32 %v931_v17, 0.0 }
 0x119   : > { %v1320_v20 = vmax.f32 %v1169_v14, 0.0  ;;  %v1257_v22 = vmax.f32 %v1011_v18, 0.0 }
 0x11a   : > { %1417 = vst.msk [vmem:[%s2150_s28 + $0x280] sm:$0xff] %vm1336_vm1, %v1288_v19 }
 0x11b   : > { %1449 = vst.msk [vmem:[%s2150_s28 + $0x380] sm:$0xff] %vm1336_vm1, %v1320_v20 }
 0x11c   : > { %1354 = vst.msk [vmem:[%s2150_s28 + $0x88] sm:$0xff] %vm1336_vm1, %v1225_v21 }
 0x11d   : > { %1386 = vst.msk [vmem:[%s2150_s28 + $0x188] sm:$0xff] %vm1336_vm1, %v1257_v22  ;;  %v1090_v23 = vpop.f32.mrf.mxu2  ;;  %v933_v27 = vpop.f32.mrf.mxu0 }
 0x11e   : > { %v1170_v24 = vpop.f32.mrf.mxu3  ;;  %v1091_v25 = vadd.f32 %v2138_v33, %v1090_v23  ;;  %v1013_v28 = vpop.f32.mrf.mxu1  ;;  %v934_v29 = vadd.f32 %v2138_v33, %v933_v27 }
 0x11f   : > { %v1171_v26 = vadd.f32 %v2138_v33, %v1170_v24  ;;  %v1014_v30 = vadd.f32 %v2138_v33, %v1013_v28 }
 0x120   : > { %v1289_v31 = vmax.f32 %v1091_v25, 0.0  ;;  %v1226_v34 = vmax.f32 %v934_v29, 0.0 }
 0x121   : > { %v1321_v32 = vmax.f32 %v1171_v26, 0.0  ;;  %v1258_v35 = vmax.f32 %v1014_v30, 0.0 }
 0x122   : > { %1418 = vst.msk [vmem:[%s2150_s28 + $0x288] sm:$0xff] %vm1336_vm1, %v1289_v31 }
 0x123   : > { %1450 = vst.msk [vmem:[%s2150_s28 + $0x388] sm:$0xff] %vm1336_vm1, %v1321_v32 }
 0x124   : > { %1355 = vst.msk [vmem:[%s2150_s28 + $0x90] sm:$0xff] %vm1336_vm1, %v1226_v34 }
 0x125   : > { %1387 = vst.msk [vmem:[%s2150_s28 + $0x190] sm:$0xff] %vm1336_vm1, %v1258_v35  ;;  %v1093_v36 = vpop.f32.mrf.mxu2  ;;  %v935_v40 = vpop.f32.mrf.mxu0 }
 0x126   : > { %v1173_v37 = vpop.f32.mrf.mxu3  ;;  %v1094_v38 = vadd.f32 %v2138_v33, %v1093_v36  ;;  %v1015_v41 = vpop.f32.mrf.mxu1  ;;  %v936_v42 = vadd.f32 %v2138_v33, %v935_v40 }
 0x127   : > { %v1174_v39 = vadd.f32 %v2138_v33, %v1173_v37  ;;  %v1016_v43 = vadd.f32 %v2138_v33, %v1015_v41 }
 0x128   : > { %v1290_v44 = vmax.f32 %v1094_v38, 0.0  ;;  %v1227_v46 = vmax.f32 %v936_v42, 0.0 }
 0x129   : > { %v1322_v45 = vmax.f32 %v1174_v39, 0.0  ;;  %v1259_v47 = vmax.f32 %v1016_v43, 0.0 }
 0x12a   : > { %1419 = vst.msk [vmem:[%s2150_s28 + $0x290] sm:$0xff] %vm1336_vm1, %v1290_v44 }
 0x12b   : > { %1451 = vst.msk [vmem:[%s2150_s28 + $0x390] sm:$0xff] %vm1336_vm1, %v1322_v45 }
 0x12c   : > { %1356 = vst.msk [vmem:[%s2150_s28 + $0x98] sm:$0xff] %vm1336_vm1, %v1227_v46 }
 0x12d   : > { %1388 = vst.msk [vmem:[%s2150_s28 + $0x198] sm:$0xff] %vm1336_vm1, %v1259_v47  ;;  %v1095_v48 = vpop.f32.mrf.mxu2  ;;  %v938_v52 = vpop.f32.mrf.mxu0 }
 0x12e   : > { %v1175_v49 = vpop.f32.mrf.mxu3  ;;  %v1096_v50 = vadd.f32 %v2138_v33, %v1095_v48  ;;  %v1018_v53 = vpop.f32.mrf.mxu1  ;;  %v939_v54 = vadd.f32 %v2138_v33, %v938_v52 }
 0x12f   : > { %v1176_v51 = vadd.f32 %v2138_v33, %v1175_v49  ;;  %v1019_v55 = vadd.f32 %v2138_v33, %v1018_v53 }
 0x130   : > { %v1291_v56 = vmax.f32 %v1096_v50, 0.0  ;;  %v1228_v58 = vmax.f32 %v939_v54, 0.0 }
 0x131   : > { %v1323_v57 = vmax.f32 %v1176_v51, 0.0  ;;  %v1260_v59 = vmax.f32 %v1019_v55, 0.0 }
 0x132   : > { %1420 = vst.msk [vmem:[%s2150_s28 + $0x298] sm:$0xff] %vm1336_vm1, %v1291_v56 }
 0x133   : > { %1452 = vst.msk [vmem:[%s2150_s28 + $0x398] sm:$0xff] %vm1336_vm1, %v1323_v57 }
 0x134   : > { %1357 = vst.msk [vmem:[%s2150_s28 + $0xa0] sm:$0xff] %vm1336_vm1, %v1228_v58 }
 0x135   : > { %1389 = vst.msk [vmem:[%s2150_s28 + $0x1a0] sm:$0xff] %vm1336_vm1, %v1260_v59  ;;  %v1098_v60 = vpop.f32.mrf.mxu2  ;;  %v940_v0 = vpop.f32.mrf.mxu0 }
 0x136   : > { %v1178_v61 = vpop.f32.mrf.mxu3  ;;  %v1099_v62 = vadd.f32 %v2138_v33, %v1098_v60  ;;  %v1020_v1 = vpop.f32.mrf.mxu1  ;;  %v941_v2 = vadd.f32 %v2138_v33, %v940_v0 }
 0x137   : > { %v1179_v63 = vadd.f32 %v2138_v33, %v1178_v61  ;;  %v1021_v3 = vadd.f32 %v2138_v33, %v1020_v1 }
 0x138   : > { %v1292_v4 = vmax.f32 %v1099_v62, 0.0  ;;  %v1229_v6 = vmax.f32 %v941_v2, 0.0 }
 0x139   : > { %v1324_v5 = vmax.f32 %v1179_v63, 0.0  ;;  %v1261_v7 = vmax.f32 %v1021_v3, 0.0 }
 0x13a   : > { %1421 = vst.msk [vmem:[%s2150_s28 + $0x2a0] sm:$0xff] %vm1336_vm1, %v1292_v4 }
 0x13b   : > { %1453 = vst.msk [vmem:[%s2150_s28 + $0x3a0] sm:$0xff] %vm1336_vm1, %v1324_v5 }
 0x13c   : > { %1358 = vst.msk [vmem:[%s2150_s28 + $0xa8] sm:$0xff] %vm1336_vm1, %v1229_v6 }
 0x13d   : > { %1390 = vst.msk [vmem:[%s2150_s28 + $0x1a8] sm:$0xff] %vm1336_vm1, %v1261_v7  ;;  %v1100_v8 = vpop.f32.mrf.mxu2  ;;  %v943_v12 = vpop.f32.mrf.mxu0 }
 0x13e   : > { %v1180_v9 = vpop.f32.mrf.mxu3  ;;  %v1101_v10 = vadd.f32 %v2138_v33, %v1100_v8  ;;  %v1023_v13 = vpop.f32.mrf.mxu1  ;;  %v944_v14 = vadd.f32 %v2138_v33, %v943_v12 }
 0x13f   : > { %v1181_v11 = vadd.f32 %v2138_v33, %v1180_v9  ;;  %v1024_v15 = vadd.f32 %v2138_v33, %v1023_v13 }
 0x140   : > { %v1293_v16 = vmax.f32 %v1101_v10, 0.0  ;;  %v1230_v18 = vmax.f32 %v944_v14, 0.0 }
 0x141   : > { %v1325_v17 = vmax.f32 %v1181_v11, 0.0  ;;  %v1262_v19 = vmax.f32 %v1024_v15, 0.0 }
 0x142   : > { %1422 = vst.msk [vmem:[%s2150_s28 + $0x2a8] sm:$0xff] %vm1336_vm1, %v1293_v16 }
 0x143   : > { %1454 = vst.msk [vmem:[%s2150_s28 + $0x3a8] sm:$0xff] %vm1336_vm1, %v1325_v17 }
 0x144   : > { %1359 = vst.msk [vmem:[%s2150_s28 + $0xb0] sm:$0xff] %vm1336_vm1, %v1230_v18 }
 0x145   : > { %1391 = vst.msk [vmem:[%s2150_s28 + $0x1b0] sm:$0xff] %vm1336_vm1, %v1262_v19  ;;  %v1103_v20 = vpop.f32.mrf.mxu2  ;;  %v945_v24 = vpop.f32.mrf.mxu0 }
 0x146   : > { %v1183_v21 = vpop.f32.mrf.mxu3  ;;  %v1104_v22 = vadd.f32 %v2138_v33, %v1103_v20  ;;  %v1025_v25 = vpop.f32.mrf.mxu1  ;;  %v946_v26 = vadd.f32 %v2138_v33, %v945_v24 }
 0x147   : > { %v1184_v23 = vadd.f32 %v2138_v33, %v1183_v21  ;;  %v1026_v27 = vadd.f32 %v2138_v33, %v1025_v25 }
 0x148   : > { %v1294_v28 = vmax.f32 %v1104_v22, 0.0  ;;  %v1231_v30 = vmax.f32 %v946_v26, 0.0 }
 0x149   : > { %v1326_v29 = vmax.f32 %v1184_v23, 0.0  ;;  %v1263_v31 = vmax.f32 %v1026_v27, 0.0  ;;  %v1997_v23 = vld [vmem:[%s2592_s2] ss:$0 sm:$0xff] }
 0x14a   : > { %1423 = vst.msk [vmem:[%s2150_s28 + $0x2b0] sm:$0xff] %vm1336_vm1, %v1294_v28 }
 0x14b   : > { %1455 = vst.msk [vmem:[%s2150_s28 + $0x3b0] sm:$0xff] %vm1336_vm1, %v1326_v29 }
 0x14c   : > { %1360 = vst.msk [vmem:[%s2150_s28 + $0xb8] sm:$0xff] %vm1336_vm1, %v1231_v30 }
 0x14d   : > { %1392 = vst.msk [vmem:[%s2150_s28 + $0x1b8] sm:$0xff] %vm1336_vm1, %v1263_v31  ;;  %v1105_v32 = vpop.f32.mrf.mxu2  ;;  %v948_v37 = vpop.f32.mrf.mxu0 }
 0x14e   : > { %v1185_v34 = vpop.f32.mrf.mxu3  ;;  %v1106_v35 = vadd.f32 %v2138_v33, %v1105_v32  ;;  %v1028_v38 = vpop.f32.mrf.mxu1  ;;  %v949_v39 = vadd.f32 %v2138_v33, %v948_v37 }
 0x14f   : > { %v1186_v36 = vadd.f32 %v2138_v33, %v1185_v34  ;;  %v1029_v40 = vadd.f32 %v2138_v33, %v1028_v38 }
 0x150   : > { %v1295_v41 = vmax.f32 %v1106_v35, 0.0  ;;  %v1232_v43 = vmax.f32 %v949_v39, 0.0 }
 0x151   : > { %v1327_v42 = vmax.f32 %v1186_v36, 0.0  ;;  %v1264_v44 = vmax.f32 %v1029_v40, 0.0 }
 0x152   : > { %1424 = vst.msk [vmem:[%s2150_s28 + $0x2b8] sm:$0xff] %vm1336_vm1, %v1295_v41 }
 0x153   : > { %1456 = vst.msk [vmem:[%s2150_s28 + $0x3b8] sm:$0xff] %vm1336_vm1, %v1327_v42 }
 0x154   : > { %1361 = vst.msk [vmem:[%s2150_s28 + $0xc0] sm:$0xff] %vm1336_vm1, %v1232_v43 }
 0x155   : > { %1393 = vst.msk [vmem:[%s2150_s28 + $0x1c0] sm:$0xff] %vm1336_vm1, %v1264_v44  ;;  %v1108_v45 = vpop.f32.mrf.mxu2  ;;  %v950_v49 = vpop.f32.mrf.mxu0 }
 0x156   : > { %v1188_v46 = vpop.f32.mrf.mxu3  ;;  %v1109_v47 = vadd.f32 %v2138_v33, %v1108_v45  ;;  %v1030_v50 = vpop.f32.mrf.mxu1  ;;  %v951_v51 = vadd.f32 %v2138_v33, %v950_v49 }
 0x157   : > { %v1189_v48 = vadd.f32 %v2138_v33, %v1188_v46  ;;  %v1031_v52 = vadd.f32 %v2138_v33, %v1030_v50 }
 0x158   : > { %v1296_v53 = vmax.f32 %v1109_v47, 0.0  ;;  %v1233_v55 = vmax.f32 %v951_v51, 0.0 }
 0x159   : > { %v1328_v54 = vmax.f32 %v1189_v48, 0.0  ;;  %v1265_v56 = vmax.f32 %v1031_v52, 0.0 }
 0x15a   : > { %1425 = vst.msk [vmem:[%s2150_s28 + $0x2c0] sm:$0xff] %vm1336_vm1, %v1296_v53 }
 0x15b   : > { %1457 = vst.msk [vmem:[%s2150_s28 + $0x3c0] sm:$0xff] %vm1336_vm1, %v1328_v54 }
 0x15c   : > { %1362 = vst.msk [vmem:[%s2150_s28 + $0xc8] sm:$0xff] %vm1336_vm1, %v1233_v55 }
 0x15d   : > { %1394 = vst.msk [vmem:[%s2150_s28 + $0x1c8] sm:$0xff] %vm1336_vm1, %v1265_v56  ;;  %v1110_v57 = vpop.f32.mrf.mxu2  ;;  %v953_v61 = vpop.f32.mrf.mxu0 }
 0x15e   : > { %v1190_v58 = vpop.f32.mrf.mxu3  ;;  %v1111_v59 = vadd.f32 %v2138_v33, %v1110_v57  ;;  %v1033_v62 = vpop.f32.mrf.mxu1  ;;  %v954_v63 = vadd.f32 %v2138_v33, %v953_v61 }
 0x15f   : > { %v1191_v60 = vadd.f32 %v2138_v33, %v1190_v58  ;;  %v1034_v0 = vadd.f32 %v2138_v33, %v1033_v62 }
 0x160   : > { %v1297_v1 = vmax.f32 %v1111_v59, 0.0  ;;  %v1234_v3 = vmax.f32 %v954_v63, 0.0 }
 0x161   : > { %v1329_v2 = vmax.f32 %v1191_v60, 0.0  ;;  %v1266_v4 = vmax.f32 %v1034_v0, 0.0 }
 0x162   : > { %1426 = vst.msk [vmem:[%s2150_s28 + $0x2c8] sm:$0xff] %vm1336_vm1, %v1297_v1 }
 0x163   : > { %1458 = vst.msk [vmem:[%s2150_s28 + $0x3c8] sm:$0xff] %vm1336_vm1, %v1329_v2 }
 0x164   : > { %1363 = vst.msk [vmem:[%s2150_s28 + $0xd0] sm:$0xff] %vm1336_vm1, %v1234_v3 }
 0x165   : > { %1395 = vst.msk [vmem:[%s2150_s28 + $0x1d0] sm:$0xff] %vm1336_vm1, %v1266_v4  ;;  %v1113_v5 = vpop.f32.mrf.mxu2  ;;  %v955_v9 = vpop.f32.mrf.mxu0 }
 0x166   : > { %v1193_v6 = vpop.f32.mrf.mxu3  ;;  %v1114_v7 = vadd.f32 %v2138_v33, %v1113_v5  ;;  %v1035_v10 = vpop.f32.mrf.mxu1  ;;  %v956_v11 = vadd.f32 %v2138_v33, %v955_v9 }
 0x167   : > { %v1194_v8 = vadd.f32 %v2138_v33, %v1193_v6  ;;  %v1036_v12 = vadd.f32 %v2138_v33, %v1035_v10 }
 0x168   : > { %v1298_v13 = vmax.f32 %v1114_v7, 0.0  ;;  %v1235_v15 = vmax.f32 %v956_v11, 0.0 }
 0x169   : > { %v1330_v14 = vmax.f32 %v1194_v8, 0.0  ;;  %v1267_v16 = vmax.f32 %v1036_v12, 0.0 }
 0x16a   : > { %1427 = vst.msk [vmem:[%s2150_s28 + $0x2d0] sm:$0xff] %vm1336_vm1, %v1298_v13 }
 0x16b   : > { %1459 = vst.msk [vmem:[%s2150_s28 + $0x3d0] sm:$0xff] %vm1336_vm1, %v1330_v14 }
 0x16c   : > { %1364 = vst.msk [vmem:[%s2150_s28 + $0xd8] sm:$0xff] %vm1336_vm1, %v1235_v15 }
 0x16d   : > { %1396 = vst.msk [vmem:[%s2150_s28 + $0x1d8] sm:$0xff] %vm1336_vm1, %v1267_v16  ;;  %v1115_v17 = vpop.f32.mrf.mxu2  ;;  %v958_v21 = vpop.f32.mrf.mxu0 }
 0x16e   : > { %v1195_v18 = vpop.f32.mrf.mxu3  ;;  %v1116_v19 = vadd.f32 %v2138_v33, %v1115_v17  ;;  %v1038_v22 = vpop.f32.mrf.mxu1  ;;  %v959_v24 = vadd.f32 %v1997_v23, %v958_v21 }
 0x16f   : > { %v1196_v20 = vadd.f32 %v2138_v33, %v1195_v18  ;;  %v1039_v25 = vadd.f32 %v1997_v23, %v1038_v22 }
 0x170   : > { %v1299_v26 = vmax.f32 %v1116_v19, 0.0  ;;  %v1236_v28 = vmax.f32 %v959_v24, 0.0 }
 0x171   : > { %v1331_v27 = vmax.f32 %v1196_v20, 0.0  ;;  %v1268_v29 = vmax.f32 %v1039_v25, 0.0 }
 0x172   : > { %1428 = vst.msk [vmem:[%s2150_s28 + $0x2d8] sm:$0xff] %vm1336_vm1, %v1299_v26 }
 0x173   : > { %1460 = vst.msk [vmem:[%s2150_s28 + $0x3d8] sm:$0xff] %vm1336_vm1, %v1331_v27 }
 0x174   : > { %1365 = vst.msk [vmem:[%s2150_s28 + $0xe0] sm:$0xff] %vm1336_vm1, %v1236_v28 }
 0x175   : > { %1397 = vst.msk [vmem:[%s2150_s28 + $0x1e0] sm:$0xff] %vm1336_vm1, %v1268_v29  ;;  %v1118_v33 = vpop.f32.mrf.mxu2  ;;  %v960_v34 = vpop.f32.mrf.mxu0 }
 0x176   : > { %v1198_v30 = vpop.f32.mrf.mxu3  ;;  %v1119_v31 = vadd.f32 %v1997_v23, %v1118_v33  ;;  %v1040_v35 = vpop.f32.mrf.mxu1  ;;  %v961_v36 = vadd.f32 %v1997_v23, %v960_v34 }
 0x177   : > { %v1199_v32 = vadd.f32 %v1997_v23, %v1198_v30  ;;  %v1041_v37 = vadd.f32 %v1997_v23, %v1040_v35 }
 0x178   : > { %v1300_v38 = vmax.f32 %v1119_v31, 0.0  ;;  %v1237_v40 = vmax.f32 %v961_v36, 0.0 }
 0x179   : > { %v1332_v39 = vmax.f32 %v1199_v32, 0.0  ;;  %v1269_v41 = vmax.f32 %v1041_v37, 0.0 }
 0x17a   : > { %1429 = vst.msk [vmem:[%s2150_s28 + $0x2e0] sm:$0xff] %vm1336_vm1, %v1300_v38 }
 0x17b   : > { %1461 = vst.msk [vmem:[%s2150_s28 + $0x3e0] sm:$0xff] %vm1336_vm1, %v1332_v39 }
 0x17c   : > { %1366 = vst.msk [vmem:[%s2150_s28 + $0xe8] sm:$0xff] %vm1336_vm1, %v1237_v40 }
 0x17d   : > { %1398 = vst.msk [vmem:[%s2150_s28 + $0x1e8] sm:$0xff] %vm1336_vm1, %v1269_v41  ;;  %v1120_v42 = vpop.f32.mrf.mxu2  ;;  %v963_v46 = vpop.f32.mrf.mxu0 }
 0x17e   : > { %v1200_v43 = vpop.f32.mrf.mxu3  ;;  %v1121_v44 = vadd.f32 %v1997_v23, %v1120_v42  ;;  %v1043_v47 = vpop.f32.mrf.mxu1  ;;  %v964_v48 = vadd.f32 %v1997_v23, %v963_v46 }
 0x17f   : > { %v1201_v45 = vadd.f32 %v1997_v23, %v1200_v43  ;;  %v1044_v49 = vadd.f32 %v1997_v23, %v1043_v47 }
 0x180   : > { %v1301_v50 = vmax.f32 %v1121_v44, 0.0  ;;  %v1238_v52 = vmax.f32 %v964_v48, 0.0 }
 0x181   : > { %v1333_v51 = vmax.f32 %v1201_v45, 0.0  ;;  %v1270_v53 = vmax.f32 %v1044_v49, 0.0 }
 0x182   : > { %1430 = vst.msk [vmem:[%s2150_s28 + $0x2e8] sm:$0xff] %vm1336_vm1, %v1301_v50 }
 0x183   : > { %1462 = vst.msk [vmem:[%s2150_s28 + $0x3e8] sm:$0xff] %vm1336_vm1, %v1333_v51 }
 0x184   : > { %1367 = vst.msk [vmem:[%s2150_s28 + $0xf0] sm:$0xff] %vm1336_vm1, %v1238_v52 }
 0x185   : > { %1399 = vst.msk [vmem:[%s2150_s28 + $0x1f0] sm:$0xff] %vm1336_vm1, %v1270_v53  ;;  %v1123_v54 = vpop.f32.mrf.mxu2  ;;  %v965_v58 = vpop.f32.mrf.mxu0 }
 0x186   : > { %v1203_v55 = vpop.f32.mrf.mxu3  ;;  %v1124_v56 = vadd.f32 %v1997_v23, %v1123_v54  ;;  %v1045_v59 = vpop.f32.mrf.mxu1  ;;  %v966_v60 = vadd.f32 %v1997_v23, %v965_v58 }
 0x187   : > { %v1204_v57 = vadd.f32 %v1997_v23, %v1203_v55  ;;  %v1046_v61 = vadd.f32 %v1997_v23, %v1045_v59 }
 0x188   : > { %v1302_v62 = vmax.f32 %v1124_v56, 0.0  ;;  %v1239_v0 = vmax.f32 %v966_v60, 0.0 }
 0x189   : > { %v1334_v63 = vmax.f32 %v1204_v57, 0.0  ;;  %v1271_v1 = vmax.f32 %v1046_v61, 0.0 }
 0x18a   : > { %1431 = vst.msk [vmem:[%s2150_s28 + $0x2f0] sm:$0xff] %vm1336_vm1, %v1302_v62 }
 0x18b   : > { %1463 = vst.msk [vmem:[%s2150_s28 + $0x3f0] sm:$0xff] %vm1336_vm1, %v1334_v63 }
 0x18c   : > { %1368 = vst.msk [vmem:[%s2150_s28 + $0xf8] sm:$0xff] %vm1336_vm1, %v1239_v0 }
 0x18d   : > { %1400 = vst.msk [vmem:[%s2150_s28 + $0x1f8] sm:$0xff] %vm1336_vm1, %v1271_v1  ;;  %v1125_v2 = vpop.f32.mrf.mxu2 }
 0x18e   : > { %v1205_v3 = vpop.f32.mrf.mxu3  ;;  %v1126_v4 = vadd.f32 %v1997_v23, %v1125_v2 }
 0x18f   : > { %v1206_v5 = vadd.f32 %v1997_v23, %v1205_v3 }
 0x190   : > { %v1303_v6 = vmax.f32 %v1126_v4, 0.0 }
 0x191   : > { %v1335_v7 = vmax.f32 %v1206_v5, 0.0 }
 0x192   : > { %1432 = vst.msk [vmem:[%s2150_s28 + $0x2f8] sm:$0xff] %vm1336_vm1, %v1303_v6 }
 0x193   : > { %1464 = vst.msk [vmem:[%s2150_s28 + $0x3f8] sm:$0xff] %vm1336_vm1, %v1335_v7 }
 0x194 PF: > { %s13_s14 = sadd.s32 1, %s2020_s14   ;;  %s2594_s12 = smov %s2016_s13 }
 0x195   : > { %p10_p5 = scmp.ge.s32.totalorder %s13_s14, 98   ;;  %s2595_s13 = smov %s2597_s15 }
 0x197   :  { %12 = sbr.rel (!%p10_p5) target bundleno = 2 (0x2), region = 68 }

</bundles_post_ra>
